<compile_context>
chip_gen: v6e
topology: v6e:2x2x1
jax: 0.10.0
libtpu: 0.0.40
codegen_flags: <defaults>
</compile_context>

<pallas_src>
import functools

import jax
import jax.numpy as jnp
from jax.experimental import pallas as pl
from jax.experimental.pallas import tpu as pltpu

EPS = 1e-5
LANE = 128


def _prenorm_linear_kernel(x_ref, gamma_ref, beta_ref, w_ref, b_ref, o_ref):
    # x_ref:     (TM, D)        row tile of flattened (B*N, D) input
    # gamma_ref: (1, D)         LayerNorm weight
    # beta_ref:  (1, D)         LayerNorm bias
    # w_ref:     (D, D_OUT_P)   fn = Linear weight (D x lane-padded D_out)
    # b_ref:     (1, D_OUT_P)   fn = Linear bias (lane-padded)
    # o_ref:     (TM, D_OUT_P)
    x = x_ref[...].astype(jnp.float32)

    # --- LayerNorm over last axis (biased variance, like torch.nn.LayerNorm),
    #     statistics kept in f32 ---
    mean = jnp.mean(x, axis=-1, keepdims=True)
    xc = x - mean
    var = jnp.mean(xc * xc, axis=-1, keepdims=True)
    inv = jax.lax.rsqrt(var + EPS)
    y = (xc * inv) * gamma_ref[...].astype(jnp.float32) \
        + beta_ref[...].astype(jnp.float32)

    # --- fn: Linear(D -> D_OUT) on the MXU: bf16 operands, f32 accumulate ---
    out = jnp.dot(y.astype(jnp.bfloat16), w_ref[...].astype(jnp.bfloat16),
                  preferred_element_type=jnp.float32)
    out = out + b_ref[...].astype(jnp.float32)
    o_ref[...] = out.astype(o_ref.dtype)


@functools.partial(jax.jit, static_argnames=("row_tile",))
def prenorm_linear(x, gamma, beta, w, b, *, row_tile=256):
    """PreNorm(dim, Linear): fn(LayerNorm(x)).

    x:     (B, N, D)
    gamma: (D,)   beta: (D,)
    w:     (D, D_OUT)  b: (D_OUT,)
    returns (B, N, D_OUT)
    """
    B, N, D = x.shape
    D_out = w.shape[1]
    M = B * N

    # Pad rows to a multiple of row_tile (zero rows are LN-safe: eps in rsqrt).
    M_pad = row_tile * pl.cdiv(M, row_tile)
    # Pad output features to a multiple of 128 lanes -> unmasked stores.
    D_out_p = LANE * pl.cdiv(D_out, LANE)

    x2 = x.reshape(M, D)
    if M_pad != M:
        x2 = jnp.pad(x2, ((0, M_pad - M), (0, 0)))
    w_p = w if D_out_p == D_out else jnp.pad(w, ((0, 0), (0, D_out_p - D_out)))
    b_p = b if D_out_p == D_out else jnp.pad(b, ((0, D_out_p - D_out),))

    gamma2 = gamma.reshape(1, D)
    beta2 = beta.reshape(1, D)
    b2 = b_p.reshape(1, D_out_p)

    grid = (M_pad // row_tile,)

    # VMEM budget: double-buffered x/out tiles, (default double-buffered) W,
    # gamma/beta/bias. Generous 2x headroom, floor 32 MiB, cap 100 MiB.
    itemsize = 4
    vmem_bytes = itemsize * (2 * row_tile * D
                             + 2 * row_tile * D_out_p
                             + 2 * D * D_out_p
                             + 4 * D + 2 * D_out_p)
    vmem_limit = int(min(max(2 * vmem_bytes, 32 * 1024 * 1024),
                         100 * 1024 * 1024))

    cost = pl.CostEstimate(
        flops=2 * M_pad * D * D_out_p + 8 * M_pad * D,
        transcendentals=M_pad,
        bytes_accessed=itemsize * (M_pad * D + M_pad * D_out_p + D * D_out_p),
    )

    out = pl.pallas_call(
        _prenorm_linear_kernel,
        out_shape=jax.ShapeDtypeStruct((M_pad, D_out_p), x.dtype),
        grid_spec=pltpu.PrefetchScalarGridSpec(
            num_scalar_prefetch=0,
            grid=grid,
            in_specs=[
                pl.BlockSpec((row_tile, D), lambda i: (i, 0)),   # x tile
                pl.BlockSpec((1, D), lambda i: (0, 0)),          # gamma
                pl.BlockSpec((1, D), lambda i: (0, 0)),          # beta
                # NOTE: for very large D these constant operands can be
                # single-buffered (pipeline_mode=pl.Buffered(1)) to free VMEM
                # for a bigger row tile; unnecessary at these sizes.
                pl.BlockSpec((D, D_out_p), lambda i: (0, 0)),    # W
                pl.BlockSpec((1, D_out_p), lambda i: (0, 0)),    # b
            ],
            out_specs=pl.BlockSpec((row_tile, D_out_p), lambda i: (i, 0)),
        ),
        compiler_params=pltpu.CompilerParams(
            dimension_semantics=("parallel",),
            vmem_limit_bytes=vmem_limit),
        cost_estimate=cost,
    )(x2, gamma2, beta2, w_p, b2)

    return out[:M, :D_out].reshape(B, N, D_out)


def _reference(x, gamma, beta, w, b):
    xf = x.astype(jnp.float32)
    mean = jnp.mean(xf, axis=-1, keepdims=True)
    var = jnp.mean((xf - mean) ** 2, axis=-1, keepdims=True)
    y = (xf - mean) * jax.lax.rsqrt(var + EPS) * gamma + beta
    return jnp.einsum("bnd,de->bne", y, w.astype(jnp.float32)) + b


if __name__ == "__main__":
    # Small but TPU-meaningful shapes: two grid steps at row_tile=256.
    B, N, D, D_OUT = 2, 256, 32, 32

    key = jax.random.PRNGKey(0)
    kx, kw, kb = jax.random.split(key, 3)

    x = jax.random.normal(kx, (B, N, D), dtype=jnp.float32)

    # nn.LayerNorm(dim) default init: weight=1, bias=0
    gamma = jnp.ones((D,), dtype=jnp.float32)
    beta = jnp.zeros((D,), dtype=jnp.float32)

    # fn = Linear(D, D_OUT): deterministic synthetic parameters
    w = (jax.random.normal(kw, (D, D_OUT), dtype=jnp.float32)
         / jnp.sqrt(jnp.float32(D)))
    b = jax.random.normal(kb, (D_OUT,), dtype=jnp.float32) * 0.01

    out = prenorm_linear(x, gamma, beta, w, b)
    out = jax.block_until_ready(out)

    ref = _reference(x, gamma, beta, w, b)
    assert out.shape == (B, N, D_OUT)
    # bf16 MXU operands with f32 accumulation -> loosened tolerance vs f32 ref.
    assert jnp.max(jnp.abs(out - ref)) < 5e-2, "mismatch vs reference"

    print("KERNEL_OK")
</pallas_src>

<mosaic_0001>
module attributes {stable_mosaic.version = 11 : i64} {
  func.func @_prenorm_linear_kernel(%arg0: i32, %arg1: memref<256x32xf32, #tpu.memory_space<vmem>>, %arg2: memref<1x32xf32, #tpu.memory_space<vmem>>, %arg3: memref<1x32xf32, #tpu.memory_space<vmem>>, %arg4: memref<32x128xf32, #tpu.memory_space<vmem>>, %arg5: memref<1x128xf32, #tpu.memory_space<vmem>>, %arg6: memref<256x128xf32, #tpu.memory_space<vmem>>) attributes {dimension_semantics = [#tpu.dimension_semantics<parallel>], iteration_bounds = array<i64: 2>, scalar_prefetch = 0 : i64, scratch_operands = 0 : i64, tpu.core_type = #tpu.core_type<tc>, window_params = [{transform_indices = @transform_0, window_bounds = array<i64: 256, 32>}, {pipeline_mode = #tpu.pipeline_mode<synchronous>, transform_indices = @transform_1, window_bounds = array<i64: 1, 32>}, {pipeline_mode = #tpu.pipeline_mode<synchronous>, transform_indices = @transform_2, window_bounds = array<i64: 1, 32>}, {pipeline_mode = #tpu.pipeline_mode<synchronous>, transform_indices = @transform_3, window_bounds = array<i64: 32, 128>}, {pipeline_mode = #tpu.pipeline_mode<synchronous>, transform_indices = @transform_4, window_bounds = array<i64: 1, 128>}, {transform_indices = @transform_5, window_bounds = array<i64: 256, 128>}]} {
    %c0 = arith.constant 0 : index
    %c0_0 = arith.constant 0 : index
    %0 = vector.load %arg1[%c0, %c0_0] : memref<256x32xf32, #tpu.memory_space<vmem>>, vector<256x32xf32>
    %cst = arith.constant dense<0.000000e+00> : vector<256xf32>
    %1 = vector.multi_reduction <add>, %0, %cst [1] : vector<256x32xf32> to vector<256xf32>
    %2 = vector.shape_cast %1 : vector<256xf32> to vector<256x1xf32>
    %cst_1 = arith.constant 3.200000e+01 : f32
    %3 = vector.broadcast %cst_1 : f32 to vector<256x1xf32>
    %4 = arith.divf %2, %3 : vector<256x1xf32>
    %5 = vector.broadcast %4 : vector<256x1xf32> to vector<256x32xf32>
    %6 = arith.subf %0, %5 : vector<256x32xf32>
    %7 = arith.mulf %6, %6 : vector<256x32xf32>
    %cst_2 = arith.constant dense<0.000000e+00> : vector<256xf32>
    %8 = vector.multi_reduction <add>, %7, %cst_2 [1] : vector<256x32xf32> to vector<256xf32>
    %9 = vector.shape_cast %8 : vector<256xf32> to vector<256x1xf32>
    %cst_3 = arith.constant 3.200000e+01 : f32
    %10 = vector.broadcast %cst_3 : f32 to vector<256x1xf32>
    %11 = arith.divf %9, %10 : vector<256x1xf32>
    %cst_4 = arith.constant 9.99999974E-6 : f32
    %12 = vector.broadcast %cst_4 : f32 to vector<256x1xf32>
    %13 = arith.addf %11, %12 : vector<256x1xf32>
    %14 = math.rsqrt %13 : vector<256x1xf32>
    %15 = vector.broadcast %14 : vector<256x1xf32> to vector<256x32xf32>
    %16 = arith.mulf %6, %15 : vector<256x32xf32>
    %c0_5 = arith.constant 0 : index
    %c0_6 = arith.constant 0 : index
    %17 = vector.load %arg2[%c0_5, %c0_6] : memref<1x32xf32, #tpu.memory_space<vmem>>, vector<1x32xf32>
    %18 = vector.broadcast %17 : vector<1x32xf32> to vector<256x32xf32>
    %19 = arith.mulf %16, %18 : vector<256x32xf32>
    %c0_7 = arith.constant 0 : index
    %c0_8 = arith.constant 0 : index
    %20 = vector.load %arg3[%c0_7, %c0_8] : memref<1x32xf32, #tpu.memory_space<vmem>>, vector<1x32xf32>
    %21 = vector.broadcast %20 : vector<1x32xf32> to vector<256x32xf32>
    %22 = arith.addf %19, %21 : vector<256x32xf32>
    %23 = arith.truncf %22 : vector<256x32xf32> to vector<256x32xbf16>
    %c0_9 = arith.constant 0 : index
    %c0_10 = arith.constant 0 : index
    %24 = vector.load %arg4[%c0_9, %c0_10] : memref<32x128xf32, #tpu.memory_space<vmem>>, vector<32x128xf32>
    %25 = arith.truncf %24 : vector<32x128xf32> to vector<32x128xbf16>
    %cst_11 = arith.constant dense<0.000000e+00> : vector<256x128xf32>
    %26 = tpu.matmul %23, %25, %cst_11 {dimension_numbers = #tpu.dot_dimension_numbers<[1], [0], [0], [1], [0, 0, 1, 1], [], []>} : vector<256x32xbf16>, vector<32x128xbf16>, vector<256x128xf32> -> vector<256x128xf32>
    %c0_12 = arith.constant 0 : index
    %c0_13 = arith.constant 0 : index
    %27 = vector.load %arg5[%c0_12, %c0_13] : memref<1x128xf32, #tpu.memory_space<vmem>>, vector<1x128xf32>
    %28 = vector.broadcast %27 : vector<1x128xf32> to vector<256x128xf32>
    %29 = arith.addf %26, %28 : vector<256x128xf32>
    %c0_14 = arith.constant 0 : index
    %c0_15 = arith.constant 0 : index
    %30 = vector.load %arg6[%c0_14, %c0_15] : memref<256x128xf32, #tpu.memory_space<vmem>>, vector<256x128xf32>
    tpu.vector_store %arg6[%c0_14, %c0_15], %29 {strides = array<i32>} : memref<256x128xf32, #tpu.memory_space<vmem>>, vector<256x128xf32>,
    return
  }
  func.func @transform_0(%arg0: i32) -> (i32, i32) {
    %c0_i32 = arith.constant 0 : i32
    %c0_i32_0 = arith.constant 0 : i32
    return %arg0, %c0_i32 : i32, i32
  }
  func.func @transform_1(%arg0: i32) -> (i32, i32) {
    %c0_i32 = arith.constant 0 : i32
    %c0_i32_0 = arith.constant 0 : i32
    %c0_i32_1 = arith.constant 0 : i32
    return %c0_i32, %c0_i32_0 : i32, i32
  }
  func.func @transform_2(%arg0: i32) -> (i32, i32) {
    %c0_i32 = arith.constant 0 : i32
    %c0_i32_0 = arith.constant 0 : i32
    %c0_i32_1 = arith.constant 0 : i32
    return %c0_i32, %c0_i32_0 : i32, i32
  }
  func.func @transform_3(%arg0: i32) -> (i32, i32) {
    %c0_i32 = arith.constant 0 : i32
    %c0_i32_0 = arith.constant 0 : i32
    %c0_i32_1 = arith.constant 0 : i32
    return %c0_i32, %c0_i32_0 : i32, i32
  }
  func.func @transform_4(%arg0: i32) -> (i32, i32) {
    %c0_i32 = arith.constant 0 : i32
    %c0_i32_0 = arith.constant 0 : i32
    %c0_i32_1 = arith.constant 0 : i32
    return %c0_i32, %c0_i32_0 : i32, i32
  }
  func.func @transform_5(%arg0: i32) -> (i32, i32) {
    %c0_i32 = arith.constant 0 : i32
    %c0_i32_0 = arith.constant 0 : i32
    return %arg0, %c0_i32 : i32, i32
  }
}

</mosaic_0001>

<bundles_post_ra>
// kernel: prenorm_linear.1
= control target key start
LH: loop header
LB: loop body
LE: loop exit
PB: predicated region body
PF: predicated region fallthrough
CT: control target
= control target key end

     0   :  { %s1281_s18 = smov 0   ;;  %s1864_s0 = inlined_call_operand.vmem [shape: f32[512,32], index: 0, kind: input, shape index: {}]   ;;  %s1865_s1 = inlined_call_operand.vmem [shape: f32[1,32], index: 1, kind: input, shape index: {}]   ;;  %s1866_s2 = inlined_call_operand.vmem [shape: f32[1,32], index: 2, kind: input, shape index: {}]   ;;  %s1867_s3 = inlined_call_operand.vmem [shape: f32[32,128], index: 3, kind: input, shape index: {}]   ;;  %s1868_s4 = inlined_call_operand.vmem [shape: f32[1,128], index: 4, kind: input, shape index: {}]   ;;  %s1869_s5 = inlined_call_operand.vmem [shape: f32[512,128], index: 5, kind: output, shape index: {}]  }
   0x1 LB: > { %s1083_s19 = sadd.s32 4294967295, %s1249_s18   ;;  %p1087_p0 = scmp.ge.s32.totalorder %s1249_s18, 1  ;;  %s1249_s18 = sphi %s1281_s18, %s15_s18  }
   0x2   : > { %p188_p1 = scmp.lt.s32.totalorder %s1249_s18, 3 }
   0x4   : > { %p189_p2 = pnand %p1087_p0, %p188_p1 }
   0x5   : > { %s1088_s20 = sshll.u32 (!%p189_p2), %s1083_s19, 5 }
   0x6   : > { %192 = sbr.rel (%p189_p2) target bundleno = 591 (0x24f), region = 40  ;;  %p217_p3 = scmp.lt.s32.totalorder (!%p189_p2), %s1088_s20, 63 }
   0xb   : > { %s1871_s20 = smov (!%p217_p3, %s1088_s20), 63  ;;  %vm261_vm0 = vcmask 261120  }
   0xc   : > { %s1089_s21 = sshll.u32 %s1871_s20, 3 }
   0xd   : > { %s1297_s24 = scalar_lea.vmem %s1864_s0, %s1089_s21  ;;  %s1795_s16 = scalar_lea.vmem %s1869_s5, %s1089_s21 }
   0xe   : > { %v1300_v0 = vld [vmem:[%s1297_s24] sm:$0xff]  ;;  %v1306_v2 = vld [vmem:[%s1297_s24 + $0x8] sm:$0xff]  ;;  %v1320_v8 = vld [vmem:[%s1297_s24 + $0x10] sm:$0xff] }
   0xf   : > { %v1303_v1 = vld [vmem:[%s1297_s24 + $0x80] sm:$0xff]  ;;  %v262_v3 = vsel %vm261_vm0, %v1300_v0, 0.0  ;;  %v1313_v5 = vld [vmem:[%s1297_s24 + $0x88] sm:$0xff]  ;;  %v265_v6 = vsel %vm261_vm0, %v1306_v2, 0.0  ;;  %v1323_v9 = vld [vmem:[%s1297_s24 + $0x18] sm:$0xff]  ;;  %v268_v10 = vsel %vm261_vm0, %v1320_v8, 0.0 }
  0x10   : > { %v310_v4 = vsel %vm261_vm0, %v1303_v1, 0.0  ;;  %263 = vadd.xlane.f32.xlu0 %v262_v3  ;;  %v313_v7 = vsel %vm261_vm0, %v1313_v5, 0.0  ;;  %v271_v11 = vsel %vm261_vm0, %v1323_v9, 0.0  ;;  %v1330_v12 = vld [vmem:[%s1297_s24 + $0x90] sm:$0xff]  ;;  %v1333_v13 = vld [vmem:[%s1297_s24 + $0x98] sm:$0xff]  ;;  %v1340_v16 = vld [vmem:[%s1297_s24 + $0x20] sm:$0xff] }
  0x11   : > { %311 = vadd.xlane.f32.xlu1 %v310_v4  ;;  %v316_v14 = vsel %vm261_vm0, %v1330_v12, 0.0  ;;  %v319_v15 = vsel %vm261_vm0, %v1333_v13, 0.0  ;;  %v1343_v17 = vld [vmem:[%s1297_s24 + $0x28] sm:$0xff]  ;;  %v274_v18 = vsel %vm261_vm0, %v1340_v16, 0.0  ;;  %v1350_v20 = vld [vmem:[%s1297_s24 + $0xa0] sm:$0xff]  ;;  %v1360_v24 = vld [vmem:[%s1297_s24 + $0x30] sm:$0xff] }
  0x12   : > { %v277_v19 = vsel %vm261_vm0, %v1343_v17, 0.0  ;;  %v1353_v21 = vld [vmem:[%s1297_s24 + $0xa8] sm:$0xff]  ;;  %v322_v22 = vsel %vm261_vm0, %v1350_v20, 0.0  ;;  %v1363_v25 = vld [vmem:[%s1297_s24 + $0x38] sm:$0xff]  ;;  %v280_v26 = vsel %vm261_vm0, %v1360_v24, 0.0  ;;  %v1370_v28 = vld [vmem:[%s1297_s24 + $0xb0] sm:$0xff] }
  0x13   : > { %v325_v23 = vsel %vm261_vm0, %v1353_v21, 0.0  ;;  %v283_v27 = vsel %vm261_vm0, %v1363_v25, 0.0  ;;  %v1373_v29 = vld [vmem:[%s1297_s24 + $0xb8] sm:$0xff]  ;;  %v328_v30 = vsel %vm261_vm0, %v1370_v28, 0.0  ;;  %v1380_v32 = vld [vmem:[%s1297_s24 + $0x40] sm:$0xff]  ;;  %v1383_v33 = vld [vmem:[%s1297_s24 + $0x48] sm:$0xff] }
  0x14   : > { %266 = vadd.xlane.f32.xlu0 %v265_v6  ;;  %v331_v31 = vsel %vm261_vm0, %v1373_v29, 0.0  ;;  %v286_v34 = vsel %vm261_vm0, %v1380_v32, 0.0  ;;  %v289_v35 = vsel %vm261_vm0, %v1383_v33, 0.0  ;;  %v1390_v36 = vld [vmem:[%s1297_s24 + $0xc0] sm:$0xff]  ;;  %v1393_v37 = vld [vmem:[%s1297_s24 + $0xc8] sm:$0xff]  ;;  %v1400_v40 = vld [vmem:[%s1297_s24 + $0x50] sm:$0xff] }
  0x15   : > { %314 = vadd.xlane.f32.xlu1 %v313_v7  ;;  %v334_v38 = vsel %vm261_vm0, %v1390_v36, 0.0  ;;  %v337_v39 = vsel %vm261_vm0, %v1393_v37, 0.0  ;;  %v1403_v41 = vld [vmem:[%s1297_s24 + $0x58] sm:$0xff]  ;;  %v292_v42 = vsel %vm261_vm0, %v1400_v40, 0.0  ;;  %v1410_v44 = vld [vmem:[%s1297_s24 + $0xd0] sm:$0xff]  ;;  %v1420_v48 = vld [vmem:[%s1297_s24 + $0x60] sm:$0xff] }
  0x16   : > { %v295_v43 = vsel %vm261_vm0, %v1403_v41, 0.0  ;;  %v1413_v45 = vld [vmem:[%s1297_s24 + $0xd8] sm:$0xff]  ;;  %v340_v46 = vsel %vm261_vm0, %v1410_v44, 0.0  ;;  %v1423_v49 = vld [vmem:[%s1297_s24 + $0x68] sm:$0xff]  ;;  %v298_v50 = vsel %vm261_vm0, %v1420_v48, 0.0  ;;  %v1430_v52 = vld [vmem:[%s1297_s24 + $0xe0] sm:$0xff] }
  0x17   : > { %v343_v47 = vsel %vm261_vm0, %v1413_v45, 0.0  ;;  %v301_v51 = vsel %vm261_vm0, %v1423_v49, 0.0  ;;  %v1433_v53 = vld [vmem:[%s1297_s24 + $0xe8] sm:$0xff]  ;;  %v346_v54 = vsel %vm261_vm0, %v1430_v52, 0.0  ;;  %v1440_v56 = vld [vmem:[%s1297_s24 + $0x70] sm:$0xff]  ;;  %v1443_v57 = vld [vmem:[%s1297_s24 + $0x78] sm:$0xff] }
  0x18   : > { %269 = vadd.xlane.f32.xlu0 %v268_v10  ;;  %v349_v55 = vsel %vm261_vm0, %v1433_v53, 0.0  ;;  %v304_v58 = vsel %vm261_vm0, %v1440_v56, 0.0  ;;  %v307_v59 = vsel %vm261_vm0, %v1443_v57, 0.0  ;;  %v1450_v60 = vld [vmem:[%s1297_s24 + $0xf0] sm:$0xff]  ;;  %v1453_v61 = vld [vmem:[%s1297_s24 + $0xf8] sm:$0xff] }
  0x19   : > { %272 = vadd.xlane.f32.xlu1 %v271_v11  ;;  %v352_v62 = vsel %vm261_vm0, %v1450_v60, 0.0  ;;  %v355_v63 = vsel %vm261_vm0, %v1453_v61, 0.0 }
  0x1c   : > { %317 = vadd.xlane.f32.xlu0 %v316_v14 }
  0x1d   : > { %320 = vadd.xlane.f32.xlu1 %v319_v15 }
  0x20   : > { %275 = vadd.xlane.f32.xlu0 %v274_v18 }
  0x21   : > { %278 = vadd.xlane.f32.xlu1 %v277_v19 }
  0x24   : > { %323 = vadd.xlane.f32.xlu0 %v322_v22 }
  0x25   : > { %326 = vadd.xlane.f32.xlu1 %v325_v23 }
  0x28   : > { %281 = vadd.xlane.f32.xlu0 %v280_v26 }
  0x29   : > { %284 = vadd.xlane.f32.xlu1 %v283_v27 }
  0x2c   : > { %329 = vadd.xlane.f32.xlu0 %v328_v30 }
  0x2d   : > { %332 = vadd.xlane.f32.xlu1 %v331_v31 }
  0x30   : > { %287 = vadd.xlane.f32.xlu0 %v286_v34 }
  0x31   : > { %290 = vadd.xlane.f32.xlu1 %v289_v35 }
  0x34   : > { %335 = vadd.xlane.f32.xlu0 %v334_v38 }
  0x35   : > { %338 = vadd.xlane.f32.xlu1 %v337_v39 }
  0x38   : > { %293 = vadd.xlane.f32.xlu0 %v292_v42 }
  0x39   : > { %296 = vadd.xlane.f32.xlu1 %v295_v43 }
  0x3c   : > { %341 = vadd.xlane.f32.xlu0 %v340_v46 }
  0x3d   : > { %344 = vadd.xlane.f32.xlu1 %v343_v47 }
  0x40   : > { %299 = vadd.xlane.f32.xlu0 %v298_v50 }
  0x41   : > { %302 = vadd.xlane.f32.xlu1 %v301_v51 }
  0x44   : > { %347 = vadd.xlane.f32.xlu0 %v346_v54 }
  0x45   : > { %350 = vadd.xlane.f32.xlu1 %v349_v55 }
  0x48   : > { %305 = vadd.xlane.f32.xlu0 %v304_v58 }
  0x49   : > { %308 = vadd.xlane.f32.xlu1 %v307_v59 }
  0x4c   : > { %353 = vadd.xlane.f32.xlu0 %v352_v62 }
  0x4d   : > { %356 = vadd.xlane.f32.xlu1 %v355_v63 }
  0x99   : > { %v264_v3 = vpop.xlane.xlu0 %263 }
  0x9a   : > { %v312_v4 = vpop.xlane.xlu1 %311  ;;  %v359_v6 = vmul.f32 0.03125, %v264_v3 }
  0x9b   : > { %v375_v7 = vmul.f32 0.03125, %v312_v4 }
  0x9c   : > { %v1460_v10 = vsub.f32 %v1300_v0, %v359_v6 }
  0x9d   : > { %v1463_v11 = vsub.f32 %v1303_v1, %v375_v7  ;;  %v267_v14 = vpop.xlane.xlu0 %266 }
  0x9e   : > { %v315_v15 = vpop.xlane.xlu1 %314  ;;  %v360_v18 = vmul.f32 0.03125, %v267_v14  ;;  %v423_v22 = vmul.f32 %v1460_v10, %v1460_v10 }
  0x9f   : > { %v376_v19 = vmul.f32 0.03125, %v315_v15  ;;  %v439_v23 = vmul.f32 %v1463_v11, %v1463_v11 }
  0xa0   : > { %v1470_v26 = vsub.f32 %v1306_v2, %v360_v18  ;;  %v455_v0 = vsel %vm261_vm0, %v423_v22, 0.0 }
  0xa1   : > { %v1473_v27 = vsub.f32 %v1313_v5, %v376_v19  ;;  %456 = vadd.xlane.f32.xlu0 %v455_v0  ;;  %v270_v1 = vpop.xlane.xlu0 %269  ;;  %v503_v31 = vsel %vm261_vm0, %v439_v23, 0.0 }
  0xa2   : > { %v273_v30 = vpop.xlane.xlu1 %272  ;;  %v361_v34 = vmul.f32 0.03125, %v270_v1  ;;  %v424_v38 = vmul.f32 %v1470_v26, %v1470_v26 }
  0xa3   : > { %v362_v35 = vmul.f32 0.03125, %v273_v30  ;;  %v440_v39 = vmul.f32 %v1473_v27, %v1473_v27 }
  0xa4   : > { %v1482_v2 = vsub.f32 %v1320_v8, %v361_v34  ;;  %v458_v42 = vsel %vm261_vm0, %v424_v38, 0.0 }
  0xa5   : > { %v1485_v5 = vsub.f32 %v1323_v9, %v362_v35  ;;  %504 = vadd.xlane.f32.xlu0 %v503_v31  ;;  %459 = vadd.xlane.f32.xlu1 %v458_v42  ;;  %v318_v43 = vpop.xlane.xlu0 %317  ;;  %v506_v47 = vsel %vm261_vm0, %v440_v39, 0.0 }
  0xa6   : > { %v321_v46 = vpop.xlane.xlu1 %320  ;;  %v377_v50 = vmul.f32 0.03125, %v318_v43  ;;  %v425_v54 = vmul.f32 %v1482_v2, %v1482_v2 }
  0xa7   : > { %v378_v51 = vmul.f32 0.03125, %v321_v46  ;;  %v426_v8 = vmul.f32 %v1485_v5, %v1485_v5 }
  0xa8   : > { %v1494_v55 = vsub.f32 %v1330_v12, %v377_v50  ;;  %v461_v58 = vsel %vm261_vm0, %v425_v54, 0.0 }
  0xa9   : > { %v1497_v9 = vsub.f32 %v1333_v13, %v378_v51  ;;  %507 = vadd.xlane.f32.xlu1 %v506_v47  ;;  %462 = vadd.xlane.f32.xlu0 %v461_v58  ;;  %v276_v59 = vpop.xlane.xlu0 %275  ;;  %v464_v63 = vsel %vm261_vm0, %v426_v8, 0.0 }
  0xaa   : > { %v279_v62 = vpop.xlane.xlu1 %278  ;;  %v363_v3 = vmul.f32 0.03125, %v276_v59  ;;  %v441_v6 = vmul.f32 %v1494_v55, %v1494_v55 }
  0xab   : > { %v364_v4 = vmul.f32 0.03125, %v279_v62  ;;  %v442_v12 = vmul.f32 %v1497_v9, %v1497_v9 }
  0xac   : > { %v1506_v7 = vsub.f32 %v1340_v16, %v363_v3  ;;  %v509_v14 = vsel %vm261_vm0, %v441_v6, 0.0 }
  0xad   : > { %v1509_v13 = vsub.f32 %v1343_v17, %v364_v4  ;;  %465 = vadd.xlane.f32.xlu1 %v464_v63  ;;  %510 = vadd.xlane.f32.xlu0 %v509_v14  ;;  %v324_v15 = vpop.xlane.xlu0 %323  ;;  %v512_v19 = vsel %vm261_vm0, %v442_v12, 0.0 }
  0xae   : > { %v327_v18 = vpop.xlane.xlu1 %326  ;;  %v379_v22 = vmul.f32 0.03125, %v324_v15  ;;  %v427_v0 = vmul.f32 %v1506_v7, %v1506_v7 }
  0xaf   : > { %v380_v23 = vmul.f32 0.03125, %v327_v18  ;;  %v428_v16 = vmul.f32 %v1509_v13, %v1509_v13 }
  0xb0   : > { %v1518_v1 = vsub.f32 %v1350_v20, %v379_v22  ;;  %v467_v30 = vsel %vm261_vm0, %v427_v0, 0.0 }
  0xb1   : > { %v1521_v17 = vsub.f32 %v1353_v21, %v380_v23  ;;  %513 = vadd.xlane.f32.xlu1 %v512_v19  ;;  %468 = vadd.xlane.f32.xlu0 %v467_v30  ;;  %v282_v31 = vpop.xlane.xlu0 %281  ;;  %v470_v35 = vsel %vm261_vm0, %v428_v16, 0.0 }
  0xb2   : > { %v285_v34 = vpop.xlane.xlu1 %284  ;;  %v365_v38 = vmul.f32 0.03125, %v282_v31  ;;  %v443_v42 = vmul.f32 %v1518_v1, %v1518_v1 }
  0xb3   : > { %v366_v39 = vmul.f32 0.03125, %v285_v34  ;;  %v444_v20 = vmul.f32 %v1521_v17, %v1521_v17 }
  0xb4   : > { %v1530_v43 = vsub.f32 %v1360_v24, %v365_v38  ;;  %v515_v46 = vsel %vm261_vm0, %v443_v42, 0.0 }
  0xb5   : > { %v1533_v21 = vsub.f32 %v1363_v25, %v366_v39  ;;  %471 = vadd.xlane.f32.xlu1 %v470_v35  ;;  %516 = vadd.xlane.f32.xlu0 %v515_v46  ;;  %v330_v47 = vpop.xlane.xlu0 %329  ;;  %v518_v51 = vsel %vm261_vm0, %v444_v20, 0.0 }
  0xb6   : > { %v333_v50 = vpop.xlane.xlu1 %332  ;;  %v381_v54 = vmul.f32 0.03125, %v330_v47  ;;  %v429_v58 = vmul.f32 %v1530_v43, %v1530_v43 }
  0xb7   : > { %v382_v8 = vmul.f32 0.03125, %v333_v50  ;;  %v430_v24 = vmul.f32 %v1533_v21, %v1533_v21 }
  0xb8   : > { %v1542_v59 = vsub.f32 %v1370_v28, %v381_v54  ;;  %v473_v62 = vsel %vm261_vm0, %v429_v58, 0.0 }
  0xb9   : > { %v1545_v25 = vsub.f32 %v1373_v29, %v382_v8  ;;  %519 = vadd.xlane.f32.xlu1 %v518_v51  ;;  %474 = vadd.xlane.f32.xlu0 %v473_v62  ;;  %v288_v63 = vpop.xlane.xlu0 %287  ;;  %v476_v4 = vsel %vm261_vm0, %v430_v24, 0.0 }
  0xba   : > { %v291_v3 = vpop.xlane.xlu1 %290  ;;  %v367_v6 = vmul.f32 0.03125, %v288_v63  ;;  %v445_v14 = vmul.f32 %v1542_v59, %v1542_v59  ;;  %v776_v63 = vld [vmem:[%s1867_s3 + $0x18] sm:$0xff] }
  0xbb   : > { %v368_v12 = vmul.f32 0.03125, %v291_v3  ;;  %v446_v28 = vmul.f32 %v1545_v25, %v1545_v25 }
  0xbc   : > { %v1554_v15 = vsub.f32 %v1380_v32, %v367_v6  ;;  %v521_v18 = vsel %vm261_vm0, %v445_v14, 0.0 }
  0xbd   : > { %v1557_v29 = vsub.f32 %v1383_v33, %v368_v12  ;;  %477 = vadd.xlane.f32.xlu1 %v476_v4  ;;  %522 = vadd.xlane.f32.xlu0 %v521_v18  ;;  %v336_v19 = vpop.xlane.xlu0 %335  ;;  %v524_v23 = vsel %vm261_vm0, %v446_v28, 0.0 }
  0xbe   : > { %v339_v22 = vpop.xlane.xlu1 %338  ;;  %v383_v0 = vmul.f32 0.03125, %v336_v19  ;;  %v431_v30 = vmul.f32 %v1554_v15, %v1554_v15 }
  0xbf   : > { %v384_v16 = vmul.f32 0.03125, %v339_v22  ;;  %v432_v32 = vmul.f32 %v1557_v29, %v1557_v29 }
  0xc0   : > { %v1566_v31 = vsub.f32 %v1390_v36, %v383_v0  ;;  %v479_v34 = vsel %vm261_vm0, %v431_v30, 0.0  ;;  %v774_v0 = vld [vmem:[%s1867_s3 + $0x8] sm:$0xff] }
  0xc1   : > { %v1569_v33 = vsub.f32 %v1393_v37, %v384_v16  ;;  %525 = vadd.xlane.f32.xlu1 %v524_v23  ;;  %480 = vadd.xlane.f32.xlu0 %v479_v34  ;;  %v294_v35 = vpop.xlane.xlu0 %293  ;;  %v482_v39 = vsel %vm261_vm0, %v432_v32, 0.0 }
  0xc2   : > { %v297_v38 = vpop.xlane.xlu1 %296  ;;  %v369_v42 = vmul.f32 0.03125, %v294_v35  ;;  %v447_v46 = vmul.f32 %v1566_v31, %v1566_v31 }
  0xc3   : > { %v370_v20 = vmul.f32 0.03125, %v297_v38  ;;  %v448_v36 = vmul.f32 %v1569_v33, %v1569_v33 }
  0xc4   : > { %v1578_v47 = vsub.f32 %v1400_v40, %v369_v42  ;;  %v527_v50 = vsel %vm261_vm0, %v447_v46, 0.0 }
  0xc5   : > { %v1581_v37 = vsub.f32 %v1403_v41, %v370_v20  ;;  %483 = vadd.xlane.f32.xlu1 %v482_v39  ;;  %528 = vadd.xlane.f32.xlu0 %v527_v50  ;;  %v342_v51 = vpop.xlane.xlu0 %341  ;;  %v530_v8 = vsel %vm261_vm0, %v448_v36, 0.0  ;;  %v775_v41 = vld [vmem:[%s1867_s3 + $0x10] sm:$0xff] }
  0xc6   : > { %v345_v54 = vpop.xlane.xlu1 %344  ;;  %v385_v58 = vmul.f32 0.03125, %v342_v51  ;;  %v433_v62 = vmul.f32 %v1578_v47, %v1578_v47  ;;  %v778_v18 = vpack.c.bf16 %v776_v63, %v775_v41 }
  0xc7   : > { %v386_v24 = vmul.f32 0.03125, %v345_v54  ;;  %v434_v40 = vmul.f32 %v1581_v37, %v1581_v37 }
  0xc8   : > { %v1596_v3 = vsub.f32 %v1410_v44, %v385_v58  ;;  %v485_v6 = vsel %vm261_vm0, %v433_v62, 0.0  ;;  %1131 = vmatprep.subr.bf16.mxu0 %v778_v18  ;;  %1167 = vmatprep.subr.bf16.mxu1 %v778_v18 }
  0xc9   : > { %v1599_v4 = vsub.f32 %v1413_v45, %v386_v24  ;;  %531 = vadd.xlane.f32.xlu1 %v530_v8  ;;  %486 = vadd.xlane.f32.xlu0 %v485_v6  ;;  %v300_v12 = vpop.xlane.xlu0 %299  ;;  %v488_v28 = vsel %vm261_vm0, %v434_v40, 0.0  ;;  %v773_v45 = vld [vmem:[%s1867_s3] sm:$0xff] }
  0xca   : > { %v303_v14 = vpop.xlane.xlu1 %302  ;;  %v371_v19 = vmul.f32 0.03125, %v300_v12  ;;  %v449_v23 = vmul.f32 %v1596_v3, %v1596_v3  ;;  %1132 = vmatpush3.bf16.msra.mxu0 %v778_v18  ;;  %1169 = vmatpush3.bf16.msra.mxu1 %v778_v18  ;;  %v777_v39 = vpack.c.bf16 %v774_v0, %v773_v45 }
  0xcb   : > { %v372_v22 = vmul.f32 0.03125, %v303_v14  ;;  %v450_v44 = vmul.f32 %v1599_v4, %v1599_v4 }
  0xcc   : > { %v1614_v16 = vsub.f32 %v1420_v48, %v371_v19  ;;  %v533_v32 = vsel %vm261_vm0, %v449_v23, 0.0  ;;  %1133 = vmatprep.subr.bf16.mxu0 %v777_v39  ;;  %1168 = vmatprep.subr.bf16.mxu1 %v777_v39 }
  0xcd   : > { %v1617_v30 = vsub.f32 %v1423_v49, %v372_v22  ;;  %489 = vadd.xlane.f32.xlu1 %v488_v28  ;;  %534 = vadd.xlane.f32.xlu0 %v533_v32  ;;  %v348_v34 = vpop.xlane.xlu0 %347  ;;  %v536_v38 = vsel %vm261_vm0, %v450_v44, 0.0 }
  0xce   : > { %v351_v35 = vpop.xlane.xlu1 %350  ;;  %v387_v42 = vmul.f32 0.03125, %v348_v34  ;;  %v435_v48 = vmul.f32 %v1614_v16, %v1614_v16  ;;  %1134 = vmatpush3.bf16.msra.mxu0 %v777_v39  ;;  %1170 = vmatpush3.bf16.msra.mxu1 %v777_v39 }
  0xcf   : > { %v388_v20 = vmul.f32 0.03125, %v351_v35  ;;  %v436_v49 = vmul.f32 %v1617_v30, %v1617_v30 }
  0xd0   : > { %v1626_v46 = vsub.f32 %v1430_v52, %v387_v42  ;;  %v491_v50 = vsel %vm261_vm0, %v435_v48, 0.0 }
  0xd1   : > { %v1629_v36 = vsub.f32 %v1433_v53, %v388_v20  ;;  %537 = vadd.xlane.f32.xlu1 %v536_v38  ;;  %492 = vadd.xlane.f32.xlu0 %v491_v50  ;;  %v306_v51 = vpop.xlane.xlu0 %305  ;;  %v494_v8 = vsel %vm261_vm0, %v436_v49, 0.0 }
  0xd2   : > { %v309_v54 = vpop.xlane.xlu1 %308  ;;  %v373_v58 = vmul.f32 0.03125, %v306_v51  ;;  %v451_v62 = vmul.f32 %v1626_v46, %v1626_v46 }
  0xd3   : > { %v374_v24 = vmul.f32 0.03125, %v309_v54  ;;  %v452_v52 = vmul.f32 %v1629_v36, %v1629_v36 }
  0xd4   : > { %v1638_v53 = vsub.f32 %v1440_v56, %v373_v58  ;;  %v539_v41 = vsel %vm261_vm0, %v451_v62, 0.0 }
  0xd5   : > { %v1641_v40 = vsub.f32 %v1443_v57, %v374_v24  ;;  %495 = vadd.xlane.f32.xlu1 %v494_v8  ;;  %540 = vadd.xlane.f32.xlu0 %v539_v41  ;;  %v354_v63 = vpop.xlane.xlu0 %353  ;;  %v542_v12 = vsel %vm261_vm0, %v452_v52, 0.0 }
  0xd6   : > { %v357_v6 = vpop.xlane.xlu1 %356  ;;  %v389_v14 = vmul.f32 0.03125, %v354_v63  ;;  %v437_v18 = vmul.f32 %v1638_v53, %v1638_v53 }
  0xd7   : > { %v390_v28 = vmul.f32 0.03125, %v357_v6  ;;  %v438_v56 = vmul.f32 %v1641_v40, %v1641_v40 }
  0xd8   : > { %v1650_v19 = vsub.f32 %v1450_v60, %v389_v14  ;;  %v497_v22 = vsel %vm261_vm0, %v437_v18, 0.0 }
  0xd9   : > { %v1653_v57 = vsub.f32 %v1453_v61, %v390_v28  ;;  %543 = vadd.xlane.f32.xlu1 %v542_v12  ;;  %498 = vadd.xlane.f32.xlu0 %v497_v22  ;;  %v500_v23 = vsel %vm261_vm0, %v438_v56, 0.0 }
  0xda   : > { %v453_v44 = vmul.f32 %v1650_v19, %v1650_v19 }
  0xdb   : > { %v454_v45 = vmul.f32 %v1653_v57, %v1653_v57 }
  0xdc   : > { %v545_v0 = vsel %vm261_vm0, %v453_v44, 0.0 }
  0xdd   : > { %501 = vadd.xlane.f32.xlu1 %v500_v23  ;;  %546 = vadd.xlane.f32.xlu0 %v545_v0  ;;  %v548_v60 = vsel %vm261_vm0, %v454_v45, 0.0  ;;  %v1667_v45 = vld [vmem:[%s1865_s1] ss:$0 sm:$0xff] }
  0xe1   : > { %549 = vadd.xlane.f32.xlu1 %v548_v60 }
 0x12a   : > { %v457_v61 = vpop.xlane.xlu0 %456 }
 0x12b   : > { %v551_v32 = vmul.f32 0.03125, %v457_v61 }
 0x12d   : > { %v583_v34 = vadd.f32 1e-05, %v551_v32 }
 0x12e   : > { %v460_v35 = vpop.xlane.xlu1 %459  ;;  %v505_v38 = vpop.xlane.xlu0 %504 }
 0x12f   : > { %1179 = vrsqrt.f32 %v583_v34  ;;  %v552_v39 = vmul.f32 0.03125, %v460_v35  ;;  %v567_v42 = vmul.f32 0.03125, %v505_v38 }
 0x131   : > { %v584_v20 = vadd.f32 1e-05, %v552_v39  ;;  %v599_v48 = vadd.f32 1e-05, %v567_v42 }
 0x132   : > { %v508_v49 = vpop.xlane.xlu1 %507  ;;  %v463_v50 = vpop.xlane.xlu0 %462 }
 0x133   : > { %1181 = vrsqrt.f32 %v584_v20  ;;  %v568_v51 = vmul.f32 0.03125, %v508_v49  ;;  %v553_v54 = vmul.f32 0.03125, %v463_v50 }
 0x134   : > { %1183 = vrsqrt.f32 %v599_v48 }
 0x135   : > { %v600_v8 = vadd.f32 1e-05, %v568_v51  ;;  %v585_v58 = vadd.f32 1e-05, %v553_v54 }
 0x136   : > { %v466_v24 = vpop.xlane.xlu1 %465  ;;  %v511_v62 = vpop.xlane.xlu0 %510 }
 0x137   : > { %1185 = vrsqrt.f32 %v600_v8  ;;  %v554_v52 = vmul.f32 0.03125, %v466_v24  ;;  %v569_v41 = vmul.f32 0.03125, %v511_v62 }
 0x138   : > { %1187 = vrsqrt.f32 %v585_v58 }
 0x139   : > { %v586_v63 = vadd.f32 1e-05, %v554_v52  ;;  %v601_v6 = vadd.f32 1e-05, %v569_v41 }
 0x13a   : > { %v514_v12 = vpop.xlane.xlu1 %513  ;;  %v469_v14 = vpop.xlane.xlu0 %468 }
 0x13b   : > { %1189 = vrsqrt.f32 %v586_v63  ;;  %v570_v28 = vmul.f32 0.03125, %v514_v12  ;;  %v555_v18 = vmul.f32 0.03125, %v469_v14 }
 0x13c   : > { %v1180_v56 = vpop.eup %1179  ;;  %1191 = vrsqrt.f32 %v601_v6 }
 0x13d   : > { %v602_v22 = vadd.f32 1e-05, %v570_v28  ;;  %v587_v23 = vadd.f32 1e-05, %v555_v18  ;;  %v647_v44 = vmul.f32 %v1180_v56, %v1460_v10  ;;  %v1674_v10 = vld [vmem:[%s1866_s2] ss:$0 sm:$0xff] }
 0x13e   : > { %v472_v0 = vpop.xlane.xlu1 %471  ;;  %v517_v60 = vpop.xlane.xlu0 %516 }
 0x13f   : > { %1193 = vrsqrt.f32 %v602_v22  ;;  %v556_v61 = vmul.f32 0.03125, %v472_v0  ;;  %v571_v32 = vmul.f32 0.03125, %v517_v60  ;;  %v686_v35 = vmul.f32 %v1667_v45, %v647_v44 }
 0x140   : > { %v1182_v34 = vpop.eup %1181  ;;  %1195 = vrsqrt.f32 %v587_v23 }
 0x141   : > { %v1184_v38 = vpop.eup %1183  ;;  %v588_v39 = vadd.f32 1e-05, %v556_v61  ;;  %v603_v42 = vadd.f32 1e-05, %v571_v32  ;;  %v648_v20 = vmul.f32 %v1182_v34, %v1470_v26  ;;  %v725_v24 = vadd.f32 %v1674_v10, %v686_v35 }
 0x142   : > { %v520_v48 = vpop.xlane.xlu1 %519  ;;  %v475_v49 = vpop.xlane.xlu0 %474  ;;  %v663_v50 = vmul.f32 %v1184_v38, %v1463_v11 }
 0x143   : > { %1197 = vrsqrt.f32 %v588_v39  ;;  %v572_v51 = vmul.f32 0.03125, %v520_v48  ;;  %v557_v54 = vmul.f32 0.03125, %v475_v49  ;;  %v687_v8 = vmul.f32 %v1667_v45, %v648_v20 }
 0x144   : > { %v1186_v58 = vpop.eup %1185  ;;  %1199 = vrsqrt.f32 %v603_v42  ;;  %v702_v11 = vmul.f32 %v1667_v45, %v663_v50 }
 0x145   : > { %v1188_v62 = vpop.eup %1187  ;;  %v604_v26 = vadd.f32 1e-05, %v572_v51  ;;  %v589_v52 = vadd.f32 1e-05, %v557_v54  ;;  %v726_v41 = vadd.f32 %v1674_v10, %v687_v8  ;;  %v664_v63 = vmul.f32 %v1186_v58, %v1473_v27 }
 0x146   : > { %v478_v6 = vpop.xlane.xlu1 %477  ;;  %v523_v12 = vpop.xlane.xlu0 %522  ;;  %v649_v14 = vmul.f32 %v1188_v62, %v1482_v2  ;;  %v741_v2 = vadd.f32 %v1674_v10, %v702_v11 }
 0x147   : > { %1201 = vrsqrt.f32 %v604_v26  ;;  %v558_v28 = vmul.f32 0.03125, %v478_v6  ;;  %v573_v18 = vmul.f32 0.03125, %v523_v12  ;;  %v757_v56 = vpack.c.bf16 %v726_v41, %v725_v24 }
 0x148   : > { %v1190_v22 = vpop.eup %1189  ;;  %1203 = vrsqrt.f32 %v589_v52  ;;  %v703_v23 = vmul.f32 %v1667_v45, %v664_v63  ;;  %v688_v44 = vmul.f32 %v1667_v45, %v649_v14 }
 0x149   : > { %v1192_v0 = vpop.eup %1191  ;;  %v590_v60 = vadd.f32 1e-05, %v558_v28  ;;  %v605_v61 = vadd.f32 1e-05, %v573_v18  ;;  %1135 = vmatprep.mubr.msk.bf16.mxu0 %vm261_vm0, %v757_v56  ;;  %v650_v27 = vmul.f32 %v1190_v22, %v1485_v5 }
 0x14a   : > { %v526_v32 = vpop.xlane.xlu1 %525  ;;  %v481_v34 = vpop.xlane.xlu0 %480  ;;  %v742_v35 = vadd.f32 %v1674_v10, %v703_v23  ;;  %v665_v38 = vmul.f32 %v1192_v0, %v1494_v55  ;;  %v727_v50 = vadd.f32 %v1674_v10, %v688_v44 }
 0x14b   : > { %1205 = vrsqrt.f32 %v590_v60  ;;  %v574_v39 = vmul.f32 0.03125, %v526_v32  ;;  %v559_v42 = vmul.f32 0.03125, %v481_v34  ;;  %v689_v20 = vmul.f32 %v1667_v45, %v650_v27 }
 0x14c   : > { %v1194_v48 = vpop.eup %1193  ;;  %1207 = vrsqrt.f32 %v605_v61  ;;  %v765_v49 = vpack.c.bf16 %v742_v35, %v741_v2  ;;  %v704_v62 = vmul.f32 %v1667_v45, %v665_v38 }
 0x14d   : > { %v1196_v51 = vpop.eup %1195  ;;  %v606_v5 = vadd.f32 1e-05, %v574_v39  ;;  %v591_v54 = vadd.f32 1e-05, %v559_v42  ;;  %v728_v8 = vadd.f32 %v1674_v10, %v689_v20  ;;  %v666_v58 = vmul.f32 %v1194_v48, %v1497_v9 }
 0x14e   : > { %1151 = vmatprep.mubr.msk.bf16.mxu1 %vm261_vm0, %v765_v49  ;;  %v484_v55 = vpop.xlane.xlu1 %483  ;;  %v529_v24 = vpop.xlane.xlu0 %528  ;;  %v651_v26 = vmul.f32 %v1196_v51, %v1506_v7  ;;  %v743_v7 = vadd.f32 %v1674_v10, %v704_v62 }
 0x14f   : > { %1209 = vrsqrt.f32 %v606_v5  ;;  %v560_v52 = vmul.f32 0.03125, %v484_v55  ;;  %v575_v41 = vmul.f32 0.03125, %v529_v24  ;;  %v758_v63 = vpack.c.bf16 %v728_v8, %v727_v50 }
 0x150   : > { %v1198_v6 = vpop.eup %1197  ;;  %1211 = vrsqrt.f32 %v591_v54  ;;  %v705_v12 = vmul.f32 %v1667_v45, %v666_v58  ;;  %v690_v11 = vmul.f32 %v1667_v45, %v651_v26 }
 0x151   : > { %v1200_v14 = vpop.eup %1199  ;;  %v592_v9 = vadd.f32 1e-05, %v560_v52  ;;  %v607_v28 = vadd.f32 1e-05, %v575_v41  ;;  %1136 = vmatmul.mubr.msk.bf16.vlgmr.msra.gmra.mxu0 %vm261_vm0, %v758_v63  ;;  %v652_v18 = vmul.f32 %v1198_v6, %v1509_v13 }
 0x152   : > { %v532_v56 = vpop.xlane.xlu1 %531  ;;  %v487_v22 = vpop.xlane.xlu0 %486  ;;  %v744_v23 = vadd.f32 %v1674_v10, %v705_v12  ;;  %v667_v44 = vmul.f32 %v1200_v14, %v1518_v1  ;;  %v729_v34 = vadd.f32 %v1674_v10, %v690_v11 }
 0x153   : > { %1213 = vrsqrt.f32 %v592_v9  ;;  %v576_v0 = vmul.f32 0.03125, %v532_v56  ;;  %v561_v60 = vmul.f32 0.03125, %v487_v22  ;;  %v691_v61 = vmul.f32 %v1667_v45, %v652_v18 }
 0x154   : > { %v1202_v27 = vpop.eup %1201  ;;  %1215 = vrsqrt.f32 %v607_v28  ;;  %v766_v32 = vpack.c.bf16 %v744_v23, %v743_v7  ;;  %v706_v20 = vmul.f32 %v1667_v45, %v667_v44 }
 0x155   : > { %v1204_v2 = vpop.eup %1203  ;;  %v608_v13 = vadd.f32 1e-05, %v576_v0  ;;  %v593_v35 = vadd.f32 1e-05, %v561_v60  ;;  %v730_v38 = vadd.f32 %v1674_v10, %v691_v61  ;;  %v668_v39 = vmul.f32 %v1202_v27, %v1521_v17 }
 0x156   : > { %1152 = vmatmul.mubr.msk.bf16.vlgmr.msra.gmra.mxu1 %vm261_vm0, %v766_v32  ;;  %v490_v1 = vpop.xlane.xlu1 %489  ;;  %v535_v42 = vpop.xlane.xlu0 %534  ;;  %v653_v48 = vmul.f32 %v1204_v2, %v1530_v43  ;;  %v745_v43 = vadd.f32 %v1674_v10, %v706_v20 }
 0x157   : > { %1217 = vrsqrt.f32 %v608_v13  ;;  %v562_v49 = vmul.f32 0.03125, %v490_v1  ;;  %v577_v50 = vmul.f32 0.03125, %v535_v42  ;;  %v759_v51 = vpack.c.bf16 %v730_v38, %v729_v34 }
 0x158   : > { %v1206_v5 = vpop.eup %1205  ;;  %1219 = vrsqrt.f32 %v593_v35  ;;  %v707_v54 = vmul.f32 %v1667_v45, %v668_v39  ;;  %v692_v8 = vmul.f32 %v1667_v45, %v653_v48 }
 0x159   : > { %v1208_v58 = vpop.eup %1207  ;;  %v594_v17 = vadd.f32 1e-05, %v562_v49  ;;  %v609_v55 = vadd.f32 1e-05, %v577_v50  ;;  %1139 = vmatprep.mubr.msk.bf16.mxu0 %vm261_vm0, %v759_v51  ;;  %v654_v24 = vmul.f32 %v1206_v5, %v1533_v21 }
 0x15a   : > { %v538_v62 = vpop.xlane.xlu1 %537  ;;  %v493_v26 = vpop.xlane.xlu0 %492  ;;  %v746_v52 = vadd.f32 %v1674_v10, %v707_v54  ;;  %v669_v41 = vmul.f32 %v1208_v58, %v1542_v59  ;;  %v731_v9 = vadd.f32 %v1674_v10, %v692_v8 }
 0x15b   : > { %1221 = vrsqrt.f32 %v594_v17  ;;  %v578_v63 = vmul.f32 0.03125, %v538_v62  ;;  %v563_v6 = vmul.f32 0.03125, %v493_v26  ;;  %v693_v12 = vmul.f32 %v1667_v45, %v654_v24 }
 0x15c   : > { %v1210_v11 = vpop.eup %1209  ;;  %1223 = vrsqrt.f32 %v609_v55  ;;  %v767_v14 = vpack.c.bf16 %v746_v52, %v745_v43  ;;  %v708_v23 = vmul.f32 %v1667_v45, %v669_v41 }
 0x15d   : > { %v1212_v28 = vpop.eup %1211  ;;  %v610_v21 = vadd.f32 1e-05, %v578_v63  ;;  %v595_v18 = vadd.f32 1e-05, %v563_v6  ;;  %v732_v56 = vadd.f32 %v1674_v10, %v693_v12  ;;  %v670_v22 = vmul.f32 %v1210_v11, %v1545_v25 }
 0x15e   : > { %1155 = vmatprep.mubr.msk.bf16.mxu1 %vm261_vm0, %v767_v14  ;;  %v496_v59 = vpop.xlane.xlu1 %495  ;;  %v541_v7 = vpop.xlane.xlu0 %540  ;;  %v655_v44 = vmul.f32 %v1212_v28, %v1554_v15  ;;  %v747_v15 = vadd.f32 %v1674_v10, %v708_v23 }
 0x15f   : > { %1225 = vrsqrt.f32 %v610_v21  ;;  %v564_v0 = vmul.f32 0.03125, %v496_v59  ;;  %v579_v60 = vmul.f32 0.03125, %v541_v7  ;;  %v760_v61 = vpack.c.bf16 %v732_v56, %v731_v9 }
 0x160   : > { %v1214_v27 = vpop.eup %1213  ;;  %1227 = vrsqrt.f32 %v595_v18  ;;  %v709_v32 = vmul.f32 %v1667_v45, %v670_v22  ;;  %v694_v34 = vmul.f32 %v1667_v45, %v655_v44 }
 0x161   : > { %v1216_v2 = vpop.eup %1215  ;;  %v596_v25 = vadd.f32 1e-05, %v564_v0  ;;  %v611_v13 = vadd.f32 1e-05, %v579_v60  ;;  %1140 = vmatmul.mubr.msk.bf16.gmra.mxu0 %vm261_vm0, %v760_v61  ;;  %v656_v35 = vmul.f32 %v1214_v27, %v1557_v29 }
 0x162   : > { %v544_v38 = vpop.xlane.xlu1 %543  ;;  %v499_v39 = vpop.xlane.xlu0 %498  ;;  %v748_v1 = vadd.f32 %v1674_v10, %v709_v32  ;;  %v671_v42 = vmul.f32 %v1216_v2, %v1566_v31  ;;  %v733_v5 = vadd.f32 %v1674_v10, %v694_v34 }
 0x163   : > { %1229 = vrsqrt.f32 %v596_v25  ;;  %v580_v20 = vmul.f32 0.03125, %v544_v38  ;;  %v565_v48 = vmul.f32 0.03125, %v499_v39  ;;  %v695_v49 = vmul.f32 %v1667_v45, %v656_v35 }
 0x164   : > { %v1218_v50 = vpop.eup %1217  ;;  %1231 = vrsqrt.f32 %v611_v13  ;;  %v768_v51 = vpack.c.bf16 %v748_v1, %v747_v15  ;;  %v710_v24 = vmul.f32 %v1667_v45, %v671_v42 }
 0x165   : > { %v1220_v54 = vpop.eup %1219  ;;  %v612_v29 = vadd.f32 1e-05, %v580_v20  ;;  %v597_v8 = vadd.f32 1e-05, %v565_v48  ;;  %v734_v58 = vadd.f32 %v1674_v10, %v695_v49  ;;  %v672_v17 = vmul.f32 %v1218_v50, %v1569_v33 }
 0x166   : > { %1156 = vmatmul.mubr.msk.bf16.gmra.mxu1 %vm261_vm0, %v768_v51  ;;  %v502_v31 = vpop.xlane.xlu1 %501  ;;  %v547_v55 = vpop.xlane.xlu0 %546  ;;  %v657_v62 = vmul.f32 %v1220_v54, %v1578_v47  ;;  %v749_v47 = vadd.f32 %v1674_v10, %v710_v24 }
 0x167   : > { %1233 = vrsqrt.f32 %v612_v29  ;;  %v566_v26 = vmul.f32 0.03125, %v502_v31  ;;  %v581_v43 = vmul.f32 0.03125, %v547_v55  ;;  %v761_v52 = vpack.c.bf16 %v734_v58, %v733_v5 }
 0x168   : > { %v1222_v41 = vpop.eup %1221  ;;  %1235 = vrsqrt.f32 %v597_v8  ;;  %v711_v63 = vmul.f32 %v1667_v45, %v672_v17  ;;  %v696_v6 = vmul.f32 %v1667_v45, %v657_v62 }
 0x169   : > { %v1224_v12 = vpop.eup %1223  ;;  %v598_v33 = vadd.f32 1e-05, %v566_v26  ;;  %v613_v11 = vadd.f32 1e-05, %v581_v43  ;;  %1143 = vmatprep.mubr.msk.bf16.mxu0 %vm261_vm0, %v761_v52  ;;  %v658_v14 = vmul.f32 %v1222_v41, %v1581_v37  ;;  %v1788_v41 = vld [vmem:[%s1868_s4] ss:$0 sm:$0xff] }
 0x16a   : > { %v550_v9 = vpop.xlane.xlu1 %549  ;;  %v750_v28 = vadd.f32 %v1674_v10, %v711_v63  ;;  %v673_v21 = vmul.f32 %v1224_v12, %v1596_v3  ;;  %v735_v7 = vadd.f32 %v1674_v10, %v696_v6 }
 0x16b   : > { %1237 = vrsqrt.f32 %v598_v33  ;;  %v582_v18 = vmul.f32 0.03125, %v550_v9  ;;  %v697_v56 = vmul.f32 %v1667_v45, %v658_v14 }
 0x16c   : > { %v1226_v22 = vpop.eup %1225  ;;  %1239 = vrsqrt.f32 %v613_v11  ;;  %v769_v59 = vpack.c.bf16 %v750_v28, %v749_v47  ;;  %v712_v60 = vmul.f32 %v1667_v45, %v673_v21 }
 0x16d   : > { %v1228_v23 = vpop.eup %1227  ;;  %v614_v44 = vadd.f32 1e-05, %v582_v18  ;;  %v736_v37 = vadd.f32 %v1674_v10, %v697_v56  ;;  %v674_v0 = vmul.f32 %v1226_v22, %v1599_v4 }
 0x16e   : > { %1159 = vmatprep.mubr.msk.bf16.mxu1 %vm261_vm0, %v769_v59  ;;  %v659_v3 = vmul.f32 %v1228_v23, %v1614_v16  ;;  %v751_v2 = vadd.f32 %v1674_v10, %v712_v60 }
 0x16f   : > { %1241 = vrsqrt.f32 %v614_v44  ;;  %v762_v61 = vpack.c.bf16 %v736_v37, %v735_v7  ;;  %v713_v27 = vmul.f32 %v1667_v45, %v674_v0 }
 0x170   : > { %v1230_v32 = vpop.eup %1229  ;;  %v698_v13 = vmul.f32 %v1667_v45, %v659_v3 }
 0x171   : > { %v1232_v34 = vpop.eup %1231  ;;  %1144 = vmatmul.mubr.msk.bf16.gmra.mxu0 %vm261_vm0, %v762_v61  ;;  %v752_v25 = vadd.f32 %v1674_v10, %v713_v27  ;;  %v660_v4 = vmul.f32 %v1230_v32, %v1617_v30 }
 0x172   : > { %v675_v35 = vmul.f32 %v1232_v34, %v1626_v46  ;;  %v737_v1 = vadd.f32 %v1674_v10, %v698_v13 }
 0x173   : > { %v770_v38 = vpack.c.bf16 %v752_v25, %v751_v2  ;;  %v699_v16 = vmul.f32 %v1667_v45, %v660_v4 }
 0x174   : > { %v1234_v39 = vpop.eup %1233  ;;  %v714_v48 = vmul.f32 %v1667_v45, %v675_v35 }
 0x175   : > { %v1236_v15 = vpop.eup %1235  ;;  %1160 = vmatmul.mubr.msk.bf16.gmra.mxu1 %vm261_vm0, %v770_v38  ;;  %v738_v42 = vadd.f32 %v1674_v10, %v699_v16  ;;  %v676_v20 = vmul.f32 %v1234_v39, %v1629_v36 }
 0x176   : > { %v661_v30 = vmul.f32 %v1236_v15, %v1638_v53  ;;  %v753_v5 = vadd.f32 %v1674_v10, %v714_v48 }
 0x177   : > { %v763_v49 = vpack.c.bf16 %v738_v42, %v737_v1  ;;  %v715_v46 = vmul.f32 %v1667_v45, %v676_v20 }
 0x178   : > { %v1238_v50 = vpop.eup %1237  ;;  %v700_v8 = vmul.f32 %v1667_v45, %v661_v30 }
 0x179   : > { %v1240_v51 = vpop.eup %1239  ;;  %1147 = vmatprep.mubr.msk.bf16.mxu0 %vm261_vm0, %v763_v49  ;;  %v754_v54 = vadd.f32 %v1674_v10, %v715_v46  ;;  %v662_v29 = vmul.f32 %v1238_v50, %v1641_v40 }
 0x17a   : > { %v677_v36 = vmul.f32 %v1240_v51, %v1650_v19  ;;  %v739_v31 = vadd.f32 %v1674_v10, %v700_v8 }
 0x17b   : > { %v771_v58 = vpack.c.bf16 %v754_v54, %v753_v5  ;;  %v701_v53 = vmul.f32 %v1667_v45, %v662_v29 }
 0x17c   : > { %v1242_v17 = vpop.eup %1241  ;;  %v716_v62 = vmul.f32 %v1667_v45, %v677_v36 }
 0x17d   : > { %1163 = vmatprep.mubr.msk.bf16.mxu1 %vm261_vm0, %v771_v58  ;;  %v740_v55 = vadd.f32 %v1674_v10, %v701_v53  ;;  %v678_v24 = vmul.f32 %v1242_v17, %v1653_v57 }
 0x17e   : > { %v755_v19 = vadd.f32 %v1674_v10, %v716_v62 }
 0x17f   : > { %v764_v40 = vpack.c.bf16 %v740_v55, %v739_v31  ;;  %v717_v26 = vmul.f32 %v1667_v45, %v678_v24 }
 0x181   : > { %1148 = vmatmul.mubr.msk.bf16.gmra.mxu0 %vm261_vm0, %v764_v40  ;;  %v756_v43 = vadd.f32 %v1674_v10, %v717_v26 }
 0x183   : > { %v772_v52 = vpack.c.bf16 %v756_v43, %v755_v19 }
 0x185   : > { %1164 = vmatmul.mubr.msk.bf16.gmra.mxu1 %vm261_vm0, %v772_v52 }
 0x211   : > { %v1137_v57 = vpop.f32.mrf.mxu0 }
 0x212   : > { %v877_v45 = vadd.f32 %v1137_v57, %v1788_v41 }
 0x213   : > { %v868_v10 = vpop.f32.mrf.mxu0 }
 0x214   : > { %997 = vst [vmem:[%s1795_s16 + $0x10] sm:$0xff] %v877_v45  ;;  %v869_v63 = vadd.f32 %v1788_v41, %v868_v10 }
 0x215   : > { %v1138_v6 = vpop.f32.mrf.mxu0 }
 0x216   : > { %995 = vst [vmem:[%s1795_s16] sm:$0xff] %v869_v63  ;;  %v880_v12 = vadd.f32 %v1138_v6, %v1788_v41  ;;  %v1153_v33 = vpop.f32.mrf.mxu1 }
 0x217   : > { %v941_v11 = vadd.f32 %v1153_v33, %v1788_v41  ;;  %v871_v14 = vpop.f32.mrf.mxu0 }
 0x218   : > { %998 = vst [vmem:[%s1795_s16 + $0x18] sm:$0xff] %v880_v12  ;;  %v872_v9 = vadd.f32 %v1788_v41, %v871_v14  ;;  %v932_v47 = vpop.f32.mrf.mxu1 }
 0x219   : > { %1013 = vst [vmem:[%s1795_s16 + $0x90] sm:$0xff] %v941_v11  ;;  %v933_v28 = vadd.f32 %v1788_v41, %v932_v47 }
 0x21a   : > { %996 = vst [vmem:[%s1795_s16 + $0x8] sm:$0xff] %v872_v9  ;;  %v1154_v21 = vpop.f32.mrf.mxu1 }
 0x21b   : > { %1011 = vst [vmem:[%s1795_s16 + $0x80] sm:$0xff] %v933_v28  ;;  %v944_v18 = vadd.f32 %v1154_v21, %v1788_v41 }
 0x21c   : > { %v935_v56 = vpop.f32.mrf.mxu1 }
 0x21d   : > { %1014 = vst [vmem:[%s1795_s16 + $0x98] sm:$0xff] %v944_v18  ;;  %v936_v22 = vadd.f32 %v1788_v41, %v935_v56 }
 0x21f   : > { %1012 = vst [vmem:[%s1795_s16 + $0x88] sm:$0xff] %v936_v22 }
 0x221   : > { %v1141_v59 = vpop.f32.mrf.mxu0 }
 0x222   : > { %v893_v7 = vadd.f32 %v1141_v59, %v1788_v41 }
 0x223   : > { %v884_v23 = vpop.f32.mrf.mxu0 }
 0x224   : > { %1001 = vst [vmem:[%s1795_s16 + $0x30] sm:$0xff] %v893_v7  ;;  %v885_v44 = vadd.f32 %v1788_v41, %v884_v23 }
 0x225   : > { %v1142_v37 = vpop.f32.mrf.mxu0 }
 0x226   : > { %999 = vst [vmem:[%s1795_s16 + $0x20] sm:$0xff] %v885_v44  ;;  %v896_v0 = vadd.f32 %v1142_v37, %v1788_v41  ;;  %v1157_v60 = vpop.f32.mrf.mxu1 }
 0x227   : > { %v957_v3 = vadd.f32 %v1157_v60, %v1788_v41  ;;  %v887_v61 = vpop.f32.mrf.mxu0 }
 0x228   : > { %1002 = vst [vmem:[%s1795_s16 + $0x38] sm:$0xff] %v896_v0  ;;  %v888_v27 = vadd.f32 %v1788_v41, %v887_v61  ;;  %v948_v32 = vpop.f32.mrf.mxu1 }
 0x229   : > { %1017 = vst [vmem:[%s1795_s16 + $0xb0] sm:$0xff] %v957_v3  ;;  %v949_v34 = vadd.f32 %v1788_v41, %v948_v32 }
 0x22a   : > { %1000 = vst [vmem:[%s1795_s16 + $0x28] sm:$0xff] %v888_v27  ;;  %v1158_v2 = vpop.f32.mrf.mxu1 }
 0x22b   : > { %1015 = vst [vmem:[%s1795_s16 + $0xa0] sm:$0xff] %v949_v34  ;;  %v960_v25 = vadd.f32 %v1158_v2, %v1788_v41 }
 0x22c   : > { %v951_v4 = vpop.f32.mrf.mxu1 }
 0x22d   : > { %1018 = vst [vmem:[%s1795_s16 + $0xb8] sm:$0xff] %v960_v25  ;;  %v952_v13 = vadd.f32 %v1788_v41, %v951_v4 }
 0x22f   : > { %1016 = vst [vmem:[%s1795_s16 + $0xa8] sm:$0xff] %v952_v13 }
 0x231   : > { %v1145_v35 = vpop.f32.mrf.mxu0 }
 0x232   : > { %v909_v38 = vadd.f32 %v1145_v35, %v1788_v41 }
 0x233   : > { %v900_v16 = vpop.f32.mrf.mxu0 }
 0x234   : > { %1005 = vst [vmem:[%s1795_s16 + $0x50] sm:$0xff] %v909_v38  ;;  %v901_v39 = vadd.f32 %v1788_v41, %v900_v16 }
 0x235   : > { %v1146_v15 = vpop.f32.mrf.mxu0  ;;  %v1161_v1 = vpop.f32.mrf.mxu1 }
 0x236   : > { %1003 = vst [vmem:[%s1795_s16 + $0x40] sm:$0xff] %v901_v39  ;;  %v912_v42 = vadd.f32 %v1146_v15, %v1788_v41  ;;  %v973_v20 = vadd.f32 %v1161_v1, %v1788_v41 }
 0x237   : > { %v903_v48 = vpop.f32.mrf.mxu0  ;;  %v964_v30 = vpop.f32.mrf.mxu1 }
 0x238   : > { %1006 = vst [vmem:[%s1795_s16 + $0x58] sm:$0xff] %v912_v42  ;;  %1021 = vst [vmem:[%s1795_s16 + $0xd0] sm:$0xff] %v973_v20  ;;  %v904_v49 = vadd.f32 %v1788_v41, %v903_v48  ;;  %v965_v46 = vadd.f32 %v1788_v41, %v964_v30 }
 0x239   : > { %v1162_v50 = vpop.f32.mrf.mxu1 }
 0x23a   : > { %1004 = vst [vmem:[%s1795_s16 + $0x48] sm:$0xff] %v904_v49  ;;  %1019 = vst [vmem:[%s1795_s16 + $0xc0] sm:$0xff] %v965_v46  ;;  %v976_v51 = vadd.f32 %v1162_v50, %v1788_v41 }
 0x23b   : > { %v967_v5 = vpop.f32.mrf.mxu1 }
 0x23c   : > { %1022 = vst [vmem:[%s1795_s16 + $0xd8] sm:$0xff] %v976_v51  ;;  %v968_v54 = vadd.f32 %v1788_v41, %v967_v5 }
 0x23e   : > { %1020 = vst [vmem:[%s1795_s16 + $0xc8] sm:$0xff] %v968_v54 }
 0x241   : > { %v1149_v29 = vpop.f32.mrf.mxu0 }
 0x242   : > { %v925_v8 = vadd.f32 %v1149_v29, %v1788_v41 }
 0x243   : > { %v916_v36 = vpop.f32.mrf.mxu0 }
 0x244   : > { %1009 = vst [vmem:[%s1795_s16 + $0x70] sm:$0xff] %v925_v8  ;;  %v917_v58 = vadd.f32 %v1788_v41, %v916_v36 }
 0x245   : > { %v1150_v53 = vpop.f32.mrf.mxu0  ;;  %v1165_v17 = vpop.f32.mrf.mxu1 }
 0x246   : > { %1007 = vst [vmem:[%s1795_s16 + $0x60] sm:$0xff] %v917_v58  ;;  %v928_v31 = vadd.f32 %v1150_v53, %v1788_v41  ;;  %v989_v55 = vadd.f32 %v1165_v17, %v1788_v41 }
 0x247   : > { %v919_v24 = vpop.f32.mrf.mxu0  ;;  %v980_v62 = vpop.f32.mrf.mxu1 }
 0x248   : > { %1010 = vst [vmem:[%s1795_s16 + $0x78] sm:$0xff] %v928_v31  ;;  %1025 = vst [vmem:[%s1795_s16 + $0xf0] sm:$0xff] %v989_v55  ;;  %v920_v40 = vadd.f32 %v1788_v41, %v919_v24  ;;  %v981_v26 = vadd.f32 %v1788_v41, %v980_v62 }
 0x249   : > { %v1166_v19 = vpop.f32.mrf.mxu1 }
 0x24a   : > { %1008 = vst [vmem:[%s1795_s16 + $0x68] sm:$0xff] %v920_v40  ;;  %1023 = vst [vmem:[%s1795_s16 + $0xe0] sm:$0xff] %v981_v26  ;;  %v992_v43 = vadd.f32 %v1166_v19, %v1788_v41 }
 0x24b   : > { %v983_v52 = vpop.f32.mrf.mxu1 }
 0x24c   : > { %1026 = vst [vmem:[%s1795_s16 + $0xf8] sm:$0xff] %v992_v43  ;;  %v984_v57 = vadd.f32 %v1788_v41, %v983_v52 }
 0x24e   : > { %1024 = vst [vmem:[%s1795_s16 + $0xe8] sm:$0xff] %v984_v57 }
 0x24f PF: > { %s15_s18 = sadd.s32 1, %s1249_s18  }
 0x250   : > { %p12_p4 = scmp.ge.s32.totalorder %s15_s18, 4  }
 0x252   :  { %14 = sbr.rel (!%p12_p4) target bundleno = 1 (0x1), region = 70 }

</bundles_post_ra>
